<compile_context>
chip_gen: v6e
topology: v6e:2x2x1
jax: 0.10.0
libtpu: 0.0.40
codegen_flags: <defaults>
</compile_context>

<pallas_src>
import jax
import jax.numpy as jnp
from jax.experimental import pallas as pl
from jax.experimental.pallas import tpu as pltpu


def _round_up(x, m):
    return ((x + m - 1) // m) * m


def bilinear_q_kernel(cur_ref, nxt_ref, wt_ref, b_ref, o_ref):
    # cur_ref, nxt_ref : (TN, D)  VMEM tiles, bfloat16
    # wt_ref           : (D, D)   Linear weight transposed to [in, out], bf16
    # b_ref            : (D, 1)   bias column, float32
    # o_ref            : (1, TN)  lane-dense per-action q values, float32
    nxt = nxt_ref[...].astype(jnp.float32)                         # (TN, D)
    h = jnp.dot(cur_ref[...], wt_ref[...],
                preferred_element_type=jnp.float32)                # MXU bf16 -> f32
    q = jnp.sum(h * nxt, axis=1)                                   # (TN,)
    # Bias folded into the reduction via an MXU matvec: sum_j b[j]*nxt[i,j].
    qb = jnp.dot(nxt, b_ref[...],
                 preferred_element_type=jnp.float32)[:, 0]         # (TN,)
    o_ref[...] = (q + qb)[None, :].astype(o_ref.dtype)             # (1, TN)


def bilinear_q(cur_emb, nxt_emb, weight, bias, *, tn=512):
    """q[i] = sum_j (cur_emb @ weight.T + bias)[i, j] * nxt_emb[i, j]

    cur_emb, nxt_emb: [N, D]; weight: [D, D] (PyTorch [out, in]); bias: [D].
    Returns [N] float32.
    """
    N, D = cur_emb.shape
    assert weight.shape == (D, D) and bias.shape == (D,)
    assert tn % 128 == 0, "row tile must be a multiple of 128 (lane width)"

    # Stream the two big [N, D] tensors (and the weight) as bf16; accumulate
    # in f32 inside the kernel.  (In the full model the LSTM encoder could
    # emit bf16 embeddings directly.)
    cur = cur_emb.astype(jnp.bfloat16)
    nxt = nxt_emb.astype(jnp.bfloat16)
    wt = weight.T.astype(jnp.bfloat16)            # [out, in] -> [in, out]
    b_col = bias.astype(jnp.float32).reshape(D, 1)

    # Pick the row tile: big for throughput, but don't pad tiny batches to 512.
    tn_eff = max(128, min(tn, _round_up(N, 128)))
    n_pad = _round_up(N, tn_eff)
    if n_pad != N:
        cur = jnp.pad(cur, ((0, n_pad - N), (0, 0)))
        nxt = jnp.pad(nxt, ((0, n_pad - N), (0, 0)))

    out = pl.pallas_call(
        bilinear_q_kernel,
        out_shape=jax.ShapeDtypeStruct((1, n_pad), jnp.float32),
        grid_spec=pltpu.PrefetchScalarGridSpec(
            num_scalar_prefetch=0,
            grid=(n_pad // tn_eff,),
            in_specs=[
                pl.BlockSpec((tn_eff, D), lambda i: (i, 0)),   # current-state emb
                pl.BlockSpec((tn_eff, D), lambda i: (i, 0)),   # next-state emb
                pl.BlockSpec((D, D), lambda i: (0, 0)),        # weight (resident)
                pl.BlockSpec((D, 1), lambda i: (0, 0)),        # bias   (resident)
            ],
            out_specs=pl.BlockSpec((1, tn_eff), lambda i: (0, i)),  # lane-dense
        ),
        compiler_params=pltpu.CompilerParams(
            dimension_semantics=("parallel",)),
    )(cur, nxt, wt, b_col)
    return out[0, :N]


if __name__ == "__main__":
    # Small shapes consistent with the module: hidden_dim=64 -> D = 2*64 = 128,
    # N = 8 actions in the batch (padded internally to one 128-row tile).
    hidden_dim = 64
    D = 2 * hidden_dim
    N = 8

    key = jax.random.PRNGKey(0)
    k_cur, k_nxt, k_w, k_b = jax.random.split(key, 4)

    # Stand-ins for embed_states(...) outputs (deterministic).
    cur_emb = jax.random.normal(k_cur, (N, D), dtype=jnp.float32)
    nxt_emb = jax.random.normal(k_nxt, (N, D), dtype=jnp.float32)

    # nn.Linear(2H, 2H) parameters (PyTorch default uniform init bounds).
    bound = 1.0 / (D ** 0.5)
    weight = jax.random.uniform(k_w, (D, D), minval=-bound, maxval=bound,
                                dtype=jnp.float32)        # [out, in]
    bias = jax.random.uniform(k_b, (D,), minval=-bound, maxval=bound,
                              dtype=jnp.float32)

    q = bilinear_q(cur_emb, nxt_emb, weight, bias)
    q = jax.block_until_ready(q)

    # Reference of Bilinear.forward computed on the same bf16-rounded inputs
    # (the kernel intentionally streams embeddings/weight as bf16), with f32
    # (HIGHEST-precision) accumulation.
    cur_f = cur_emb.astype(jnp.bfloat16).astype(jnp.float32)
    nxt_f = nxt_emb.astype(jnp.bfloat16).astype(jnp.float32)
    w_f = weight.astype(jnp.bfloat16).astype(jnp.float32)
    h_ref = jnp.dot(cur_f, w_f.T, precision=jax.lax.Precision.HIGHEST) + bias
    q_ref = jnp.sum(h_ref * nxt_f, axis=1)

    assert q.shape == (N,)
    assert jnp.allclose(q, q_ref, atol=1e-2, rtol=1e-2), (q, q_ref)

    print("KERNEL_OK")
</pallas_src>

<mosaic_0001>
module attributes {stable_mosaic.version = 11 : i64} {
  func.func @bilinear_q_kernel(%arg0: i32, %arg1: memref<128x128xbf16, #tpu.memory_space<vmem>>, %arg2: memref<128x128xbf16, #tpu.memory_space<vmem>>, %arg3: memref<128x128xbf16, #tpu.memory_space<vmem>>, %arg4: memref<128x1xf32, #tpu.memory_space<vmem>>, %arg5: memref<1x128xf32, #tpu.memory_space<vmem>>) attributes {dimension_semantics = [#tpu.dimension_semantics<parallel>], iteration_bounds = array<i64: 1>, scalar_prefetch = 0 : i64, scratch_operands = 0 : i64, tpu.core_type = #tpu.core_type<tc>, window_params = [{transform_indices = @transform_0, window_bounds = array<i64: 128, 128>}, {transform_indices = @transform_1, window_bounds = array<i64: 128, 128>}, {pipeline_mode = #tpu.pipeline_mode<synchronous>, transform_indices = @transform_2, window_bounds = array<i64: 128, 128>}, {pipeline_mode = #tpu.pipeline_mode<synchronous>, transform_indices = @transform_3, window_bounds = array<i64: 128, 1>}, {transform_indices = @transform_4, window_bounds = array<i64: 1, 128>}]} {
    %c0 = arith.constant 0 : index
    %c0_0 = arith.constant 0 : index
    %0 = vector.load %arg2[%c0, %c0_0] : memref<128x128xbf16, #tpu.memory_space<vmem>>, vector<128x128xbf16>
    %1 = arith.extf %0 : vector<128x128xbf16> to vector<128x128xf32>
    %c0_1 = arith.constant 0 : index
    %c0_2 = arith.constant 0 : index
    %2 = vector.load %arg1[%c0_1, %c0_2] : memref<128x128xbf16, #tpu.memory_space<vmem>>, vector<128x128xbf16>
    %c0_3 = arith.constant 0 : index
    %c0_4 = arith.constant 0 : index
    %3 = vector.load %arg3[%c0_3, %c0_4] : memref<128x128xbf16, #tpu.memory_space<vmem>>, vector<128x128xbf16>
    %cst = arith.constant dense<0.000000e+00> : vector<128x128xf32>
    %4 = tpu.matmul %2, %3, %cst {dimension_numbers = #tpu.dot_dimension_numbers<[1], [0], [0], [1], [0, 0, 1, 1], [], []>} : vector<128x128xbf16>, vector<128x128xbf16>, vector<128x128xf32> -> vector<128x128xf32>
    %5 = arith.mulf %4, %1 : vector<128x128xf32>
    %cst_5 = arith.constant dense<0.000000e+00> : vector<128xf32>
    %6 = vector.multi_reduction <add>, %5, %cst_5 [1] : vector<128x128xf32> to vector<128xf32>
    %c0_6 = arith.constant 0 : index
    %c0_7 = arith.constant 0 : index
    %7 = vector.load %arg4[%c0_6, %c0_7] : memref<128x1xf32, #tpu.memory_space<vmem>>, vector<128x1xf32>
    %cst_8 = arith.constant dense<0.000000e+00> : vector<128x1xf32>
    %8 = tpu.matmul %1, %7, %cst_8 {dimension_numbers = #tpu.dot_dimension_numbers<[1], [0], [0], [1], [0, 0, 1, 1], [], []>} : vector<128x128xf32>, vector<128x1xf32>, vector<128x1xf32> -> vector<128x1xf32>
    %9 = vector.shape_cast %8 : vector<128x1xf32> to vector<128xf32>
    %10 = arith.addf %6, %9 : vector<128xf32>
    %11 = vector.shape_cast %10 : vector<128xf32> to vector<1x128xf32>
    %c0_9 = arith.constant 0 : index
    %c0_10 = arith.constant 0 : index
    %12 = vector.load %arg5[%c0_9, %c0_10] : memref<1x128xf32, #tpu.memory_space<vmem>>, vector<1x128xf32>
    tpu.vector_store %arg5[%c0_9, %c0_10], %11 {strides = array<i32>} : memref<1x128xf32, #tpu.memory_space<vmem>>, vector<1x128xf32>,
    return
  }
  func.func @transform_0(%arg0: i32) -> (i32, i32) {
    %c0_i32 = arith.constant 0 : i32
    %c0_i32_0 = arith.constant 0 : i32
    return %arg0, %c0_i32 : i32, i32
  }
  func.func @transform_1(%arg0: i32) -> (i32, i32) {
    %c0_i32 = arith.constant 0 : i32
    %c0_i32_0 = arith.constant 0 : i32
    return %arg0, %c0_i32 : i32, i32
  }
  func.func @transform_2(%arg0: i32) -> (i32, i32) {
    %c0_i32 = arith.constant 0 : i32
    %c0_i32_0 = arith.constant 0 : i32
    %c0_i32_1 = arith.constant 0 : i32
    return %c0_i32, %c0_i32_0 : i32, i32
  }
  func.func @transform_3(%arg0: i32) -> (i32, i32) {
    %c0_i32 = arith.constant 0 : i32
    %c0_i32_0 = arith.constant 0 : i32
    %c0_i32_1 = arith.constant 0 : i32
    return %c0_i32, %c0_i32_0 : i32, i32
  }
  func.func @transform_4(%arg0: i32) -> (i32, i32) {
    %c0_i32 = arith.constant 0 : i32
    %c0_i32_0 = arith.constant 0 : i32
    return %c0_i32, %arg0 : i32, i32
  }
}

</mosaic_0001>

<bundles_post_ra>
// kernel: tpu_custom_call.1
= control target key start
LH: loop header
LB: loop body
LE: loop exit
PB: predicated region body
PF: predicated region fallthrough
CT: control target
= control target key end

     0   :  { %9 = vsyncpa [#allocation3], 0  ;;  %s1153_s0 = inlined_call_operand.vmem [shape: bf16[128,128], index: 0, kind: input, shape index: {}]   ;;  %s1154_s1 = inlined_call_operand.vmem [shape: bf16[128,128], index: 1, kind: input, shape index: {}]   ;;  %s1155_s2 = inlined_call_operand.hbm [shape: bf16[128,128], index: 2, kind: input, shape index: {}]   ;;  %s1156_s3 = inlined_call_operand.vmem [shape: f32[128,1], index: 3, kind: input, shape index: {}]   ;;  %s1157_s4 = inlined_call_operand.hbm [shape: f32[1,128], index: 4, kind: output, shape index: {}]  }
   0x1   :  { %10 = vsyncpa [#allocation4], 0  ;;  %s965_s15 = smov [#allocation2]  }
   0x2   :  { %s20_s16 = sshll.u32 %s965_s15, 4  ;;  %s21_s16 = int_to_ptr.vmem [resolvable:$true] %s20_s16 }
   0x3   :  { %s929_s17 = scalar_lea.vmem %s21_s16, 1024  ;;  %p934_p1 = scmp.lt.s32.totalorder %s21_s16, %s21_s16 }
   0x4   :  { %p930_p0 = scmp.ne.s32.totalorder %s21_s16, %s929_s17  ;;  %p935_p2 = scmp.lt.s32.totalorder %s929_s17, %s929_s17 }
   0x6   :  { %p936_p3 = por %p935_p2, %p934_p1 }
   0x8   :  { %p937_p4 = pnand %p936_p3, %p930_p0 }
   0xa   :  { %940 = shalt.err (!%p937_p4)
}
   0xb   :  { %s966_s18 = smov 64   ;;  %s967_s19 = smov 4  }
   0xc   :  { %26 = dma.hbm_to_vmem [thread:$0]  %s1155_s2, 1024, %s21_s16, [#allocation3], %s966_s18, %s966_s18, %s967_s19  }
   0xd   :  { %961 = dma.done.wait [#allocation3], 1024  }
   0xe   :  { %962 = vsyncadd [#allocation3], 4294966272  ;;  %v905_v0 = vld [vmem:[#allocation2 + $0x38] sm:$0xff]   ;;  %v906_v1 = vld [vmem:[#allocation2 + $0x30] sm:$0xff]   ;;  %vm590_vm0 = vcmask 130112   ;;  %vm597_vm1 = vcmask 195712  }
   0xf   :  { %810 = vmatprep.subr.bf16.mxu0 %v905_v0  ;;  %v907_v2 = vld [vmem:[#allocation2 + $0x28] sm:$0xff]   ;;  %v908_v3 = vld [vmem:[#allocation2 + $0x20] sm:$0xff]   ;;  %v909_v5 = vld [vmem:[#allocation2 + $0x18] sm:$0xff]   ;;  %vm604_vm2 = vcmask 261312   ;;  %vm611_vm3 = vcmask 326912   ;;  %vm618_vm4 = vcmask 392512  }
  0x10   :  { %811 = vmatpush3.bf16.msra.mxu0 %v905_v0  ;;  %v913_v4 = vld [vmem:[%s1153_s0] sm:$0xff]   ;;  %v910_v6 = vld [vmem:[#allocation2 + $0x10] sm:$0xff]   ;;  %v353_v7 = vld [vmem:[%s1156_s3 + $0x78] sm:$0xff]  ;;  %vm625_vm5 = vcmask 458112   ;;  %vm632_vm6 = vcmask 523712   ;;  %vm639_vm7 = vcmask 589312  }
  0x11   :  { %812 = vmatprep.subr.bf16.mxu0 %v906_v1  ;;  %826 = vmatprep.mubr.bf16.mxu0 %v913_v4  ;;  %v352_v8 = vld [vmem:[%s1156_s3 + $0x70] sm:$0xff]  ;;  %v351_v9 = vld [vmem:[%s1156_s3 + $0x68] sm:$0xff]  ;;  %v350_v11 = vld [vmem:[%s1156_s3 + $0x60] sm:$0xff]  ;;  %vm646_vm8 = vcmask 654912   ;;  %vm653_vm9 = vcmask 720512   ;;  %vm660_vm10 = vcmask 786112  }
  0x12   :  { %842 = vmatprep.subr.mxu1 %v353_v7  ;;  %v911_v10 = vld [vmem:[#allocation2 + $0x8] sm:$0xff]   ;;  %v1016_v12 = vld [vmem:[%s1154_s1] sm:$0xff]   ;;  %v349_v13 = vld [vmem:[%s1156_s3 + $0x58] sm:$0xff]  ;;  %vm667_vm11 = vcmask 851712   ;;  %vm674_vm12 = vcmask 917312   ;;  %vm681_vm13 = vcmask 982912  }
  0x13   :  { %843 = vmatpush3.msra.mxu1 %v353_v7  ;;  %v725_v14 = vunpack.c.l.bf16 %v1016_v12  ;;  %v912_v15 = vld [vmem:[#allocation2] sm:$0xff]   ;;  %v348_v16 = vld [vmem:[%s1156_s3 + $0x50] sm:$0xff]  ;;  %v347_v17 = vld [vmem:[%s1156_s3 + $0x48] sm:$0xff]  ;;  %v726_v32 = vunpack.c.h.bf16 %v1016_v12  ;;  %vm688_vm14 = vcmask 1048512  }
  0x14   :  { %813 = vmatpush3.bf16.msra.mxu0 %v906_v1  ;;  %844 = vmatprep.subr.mxu1 %v352_v8  ;;  %v346_v18 = vld [vmem:[%s1156_s3 + $0x40] sm:$0xff]  ;;  %v914_v19 = vld [vmem:[%s1153_s0 + $0x8] sm:$0xff]   ;;  %v345_v20 = vld [vmem:[%s1156_s3 + $0x38] sm:$0xff] }
  0x15   :  { %814 = vmatprep.subr.bf16.mxu0 %v907_v2  ;;  %845 = vmatpush3.msra.mxu1 %v352_v8  ;;  %v915_v21 = vld [vmem:[%s1153_s0 + $0x10] sm:$0xff]   ;;  %v343_v23 = vld [vmem:[%s1156_s3 + $0x28] sm:$0xff]  ;;  %v342_v24 = vld [vmem:[%s1156_s3 + $0x20] sm:$0xff] }
  0x16   :  { %846 = vmatprep.subr.mxu1 %v351_v9  ;;  %874 = vmatprep.mubr.f32.mxu1 %v725_v14  ;;  %v344_v22 = vld [vmem:[%s1156_s3 + $0x30] sm:$0xff]  ;;  %v916_v25 = vld [vmem:[%s1153_s0 + $0x18] sm:$0xff]   ;;  %v917_v27 = vld [vmem:[%s1153_s0 + $0x20] sm:$0xff]  }
  0x17   :  { %847 = vmatpush3.msra.mxu1 %v351_v9  ;;  %v341_v26 = vld [vmem:[%s1156_s3 + $0x18] sm:$0xff]  ;;  %v340_v28 = vld [vmem:[%s1156_s3 + $0x10] sm:$0xff]  ;;  %v339_v29 = vld [vmem:[%s1156_s3 + $0x8] sm:$0xff] }
  0x18   :  { %815 = vmatpush3.bf16.msra.mxu0 %v907_v2  ;;  %848 = vmatprep.subr.mxu1 %v350_v11  ;;  %v755_v30 = vld [vmem:[%s1154_s1 + $0x8] sm:$0xff]   ;;  %v338_v31 = vld [vmem:[%s1156_s3] sm:$0xff]  ;;  %v919_v35 = vld [vmem:[%s1153_s0 + $0x30] sm:$0xff]  }
  0x19   :  { %816 = vmatprep.subr.bf16.mxu0 %v908_v3  ;;  %849 = vmatpush3.msra.mxu1 %v350_v11  ;;  %v918_v33 = vld [vmem:[%s1153_s0 + $0x28] sm:$0xff]   ;;  %v729_v34 = vunpack.c.l.bf16 %v755_v30  ;;  %v1082_v36 = vld [vmem:[%s1154_s1 + $0x10] sm:$0xff]   ;;  %v730_v37 = vunpack.c.h.bf16 %v755_v30  ;;  %v757_v39 = vld [vmem:[%s1154_s1 + $0x18] sm:$0xff]  }
  0x1a   :  { %850 = vmatprep.subr.mxu1 %v349_v13  ;;  %v733_v38 = vunpack.c.l.bf16 %v1082_v36  ;;  %v734_v40 = vunpack.c.h.bf16 %v1082_v36  ;;  %v920_v41 = vld [vmem:[%s1153_s0 + $0x38] sm:$0xff]   ;;  %v737_v42 = vunpack.c.l.bf16 %v757_v39  ;;  %v1095_v43 = vld [vmem:[%s1154_s1 + $0x20] sm:$0xff]   ;;  %v738_v44 = vunpack.c.h.bf16 %v757_v39  ;;  %v759_v46 = vld [vmem:[%s1154_s1 + $0x28] sm:$0xff]  }
  0x1b   :  { %851 = vmatpush3.msra.mxu1 %v349_v13  ;;  %v741_v45 = vunpack.c.l.bf16 %v1095_v43  ;;  %v742_v47 = vunpack.c.h.bf16 %v1095_v43  ;;  %v745_v48 = vunpack.c.l.bf16 %v759_v46  ;;  %v1105_v49 = vld [vmem:[%s1154_s1 + $0x30] sm:$0xff]   ;;  %v746_v50 = vunpack.c.h.bf16 %v759_v46  ;;  %v761_v52 = vld [vmem:[%s1154_s1 + $0x38] sm:$0xff]   ;;  %s969_s1 = smov [#allocation5]  }
  0x1c   :  { %817 = vmatpush3.bf16.msra.mxu0 %v908_v3  ;;  %852 = vmatprep.subr.mxu1 %v348_v16  ;;  %v749_v51 = vunpack.c.l.bf16 %v1105_v49  ;;  %v750_v53 = vunpack.c.h.bf16 %v1105_v49  ;;  %v753_v54 = vunpack.c.l.bf16 %v761_v52  ;;  %v754_v55 = vunpack.c.h.bf16 %v761_v52  ;;  %s698_s29 = sshll.u32 %s969_s1, 4  ;;  %s699_s29 = int_to_ptr.vmem [resolvable:$true] %s698_s29 }
  0x1d   :  { %818 = vmatprep.subr.bf16.mxu0 %v909_v5  ;;  %853 = vmatpush3.msra.mxu1 %v348_v16  ;;  %s941_s30 = scalar_lea.vmem %s699_s29, 16  ;;  %s945_s5 = scalar_lea.vmem %s699_s29, 32 }
  0x1e   :  { %854 = vmatprep.subr.mxu1 %v347_v17  ;;  %p942_p5 = scmp.ne.s32.totalorder %s699_s29, %s941_s30  ;;  %p946_p6 = scmp.lt.s32.totalorder %s699_s29, %s699_s29 }
  0x1f   :  { %855 = vmatpush3.msra.mxu1 %v347_v17  ;;  %p947_p7 = scmp.lt.s32.totalorder %s945_s5, %s941_s30 }
  0x20   :  { %819 = vmatpush3.bf16.msra.mxu0 %v909_v5  ;;  %856 = vmatprep.subr.mxu1 %v346_v18 }
  0x21   :  { %820 = vmatprep.subr.bf16.mxu0 %v910_v6  ;;  %857 = vmatpush3.msra.mxu1 %v346_v18  ;;  %p948_p8 = por %p947_p7, %p946_p6 }
  0x22   :  { %858 = vmatprep.subr.mxu1 %v345_v20 }
  0x23   :  { %859 = vmatpush3.msra.mxu1 %v345_v20  ;;  %p949_p9 = pnand %p948_p8, %p942_p5 }
  0x24   :  { %821 = vmatpush3.bf16.msra.mxu0 %v910_v6  ;;  %860 = vmatprep.subr.mxu1 %v344_v22  ;;  %v968_v6 = vmov 0  }
  0x25   :  { %822 = vmatprep.subr.bf16.mxu0 %v911_v10  ;;  %861 = vmatpush3.msra.mxu1 %v344_v22 }
  0x26   :  { %862 = vmatprep.subr.mxu1 %v343_v23  ;;  %903 = vset.pattern.permute.xlu1 %v968_v6 }
  0x27   :  { %863 = vmatpush3.msra.mxu1 %v343_v23  ;;  %904 = vset.pattern.permute.xlu0 %v968_v6 }
  0x28   :  { %823 = vmatpush3.bf16.msra.mxu0 %v911_v10  ;;  %864 = vmatprep.subr.mxu1 %v342_v24 }
  0x29   :  { %824 = vmatprep.subr.bf16.mxu0 %v912_v15  ;;  %865 = vmatpush3.msra.mxu1 %v342_v24 }
  0x2a   :  { %866 = vmatprep.subr.mxu1 %v341_v26 }
  0x2b   :  { %867 = vmatpush3.msra.mxu1 %v341_v26 }
  0x2c   :  { %825 = vmatpush3.bf16.msra.mxu0 %v912_v15  ;;  %868 = vmatprep.subr.mxu1 %v340_v28 }
  0x2d   :  { %869 = vmatpush3.msra.mxu1 %v340_v28 }
  0x2e   :  { %870 = vmatprep.subr.mxu1 %v339_v29 }
  0x2f   :  { %827 = vmatmul.mubr.bf16.vlgmr.msra.gmra.mxu0 %v914_v19  ;;  %871 = vmatpush3.msra.mxu1 %v339_v29 }
  0x30   :  { %830 = vmatprep.mubr.bf16.mxu0 %v915_v21  ;;  %872 = vmatprep.subr.mxu1 %v338_v31 }
  0x31   :  { %873 = vmatpush3.msra.mxu1 %v338_v31 }
  0x32   :  { %875 = vmatmul.mubr.f32.vlgmr.msra.gmra.mxu1 %v726_v32 }
  0x33   :  { %877 = vmatprep.mubr.f32.mxu1 %v729_v34 }
  0x36   :  { %878 = vmatmul.mubr.f32.gmra.mxu1 %v730_v37 }
  0x37   :  { %831 = vmatmul.mubr.bf16.gmra.mxu0 %v916_v25  ;;  %880 = vmatprep.mubr.f32.mxu1 %v733_v38 }
  0x38   :  { %834 = vmatprep.mubr.bf16.mxu0 %v917_v27 }
  0x3a   :  { %881 = vmatmul.mubr.f32.gmra.mxu1 %v734_v40 }
  0x3b   :  { %883 = vmatprep.mubr.f32.mxu1 %v737_v42 }
  0x3e   :  { %884 = vmatmul.mubr.f32.gmra.mxu1 %v738_v44 }
  0x3f   :  { %835 = vmatmul.mubr.bf16.gmra.mxu0 %v918_v33  ;;  %886 = vmatprep.mubr.f32.mxu1 %v741_v45 }
  0x40   :  { %838 = vmatprep.mubr.bf16.mxu0 %v919_v35 }
  0x42   :  { %887 = vmatmul.mubr.f32.gmra.mxu1 %v742_v47 }
  0x43   :  { %889 = vmatprep.mubr.f32.mxu1 %v745_v48 }
  0x46   :  { %890 = vmatmul.mubr.f32.gmra.mxu1 %v746_v50 }
  0x47   :  { %839 = vmatmul.mubr.bf16.gmra.mxu0 %v920_v41  ;;  %892 = vmatprep.mubr.f32.mxu1 %v749_v51 }
  0x4a   :  { %893 = vmatmul.mubr.f32.gmra.mxu1 %v750_v53 }
  0x4b   :  { %895 = vmatprep.mubr.f32.mxu1 %v753_v54 }
  0x4e   :  { %896 = vmatmul.mubr.f32.gmra.mxu1 %v754_v55 }
  0xef   :  { %v828_v56 = vpop.f32.mrf.mxu0 }
  0xf0   :  { %v292_v57 = vmul.f32 %v828_v56, %v729_v34 }
  0xf1   :  { %v227_v58 = vpop.f32.mrf.mxu0 }
  0xf2   :  { %310 = vadd.xlane.f32.xlu1 %v292_v57  ;;  %v290_v59 = vmul.f32 %v725_v14, %v227_v58  ;;  %v876_v25 = vpop.f32.mrf.mxu1 }
  0xf3   :  { %v829_v60 = vpop.f32.mrf.mxu0 }
  0xf4   :  { %v293_v61 = vmul.f32 %v829_v60, %v730_v37  ;;  %306 = vadd.xlane.f32.xlu0 %v290_v59  ;;  %v420_v26 = vpop.f32.mrf.mxu1 }
  0xf5   :  { %v230_v62 = vpop.f32.mrf.mxu0 }
  0xf6   :  { %v291_v63 = vmul.f32 %v726_v32, %v230_v62  ;;  %312 = vadd.xlane.f32.xlu1 %v293_v61  ;;  %v879_v27 = vpop.f32.mrf.mxu1 }
  0xf7   :  { %v832_v0 = vpop.f32.mrf.mxu0 }
  0xf8   :  { %v296_v1 = vmul.f32 %v832_v0, %v737_v42  ;;  %308 = vadd.xlane.f32.xlu0 %v291_v63  ;;  %v430_v28 = vpop.f32.mrf.mxu1 }
  0xf9   :  { %v243_v2 = vpop.f32.mrf.mxu0 }
  0xfa   :  { %v294_v7 = vmul.f32 %v733_v38, %v243_v2  ;;  %v882_v29 = vpop.f32.mrf.mxu1 }
  0xfb   :  { %v833_v3 = vpop.f32.mrf.mxu0 }
  0xfc   :  { %v297_v4 = vmul.f32 %v833_v3, %v738_v44  ;;  %318 = vadd.xlane.f32.xlu0 %v296_v1  ;;  %v440_v31 = vpop.f32.mrf.mxu1 }
  0xfd   :  { %v246_v5 = vpop.f32.mrf.mxu0 }
  0xfe   :  { %320 = vadd.xlane.f32.xlu1 %v297_v4  ;;  %v295_v9 = vmul.f32 %v734_v40, %v246_v5  ;;  %v885_v36 = vpop.f32.mrf.mxu1 }
  0xff   :  { %v836_v8 = vpop.f32.mrf.mxu0 }
 0x100   :  { %v300_v10 = vmul.f32 %v836_v8, %v745_v48  ;;  %314 = vadd.xlane.f32.xlu0 %v294_v7  ;;  %v450_v39 = vpop.f32.mrf.mxu1 }
 0x101   :  { %v259_v11 = vpop.f32.mrf.mxu0 }
 0x102   :  { %316 = vadd.xlane.f32.xlu1 %v295_v9  ;;  %v298_v13 = vmul.f32 %v741_v45, %v259_v11  ;;  %v888_v42 = vpop.f32.mrf.mxu1 }
 0x103   :  { %v837_v12 = vpop.f32.mrf.mxu0 }
 0x104   :  { %v301_v14 = vmul.f32 %v837_v12, %v746_v50  ;;  %326 = vadd.xlane.f32.xlu0 %v300_v10  ;;  %v460_v46 = vpop.f32.mrf.mxu1  ;;  %v579_v10 = vlaneseq }
 0x105   :  { %v262_v15 = vpop.f32.mrf.mxu0 }
 0x106   :  { %328 = vadd.xlane.f32.xlu1 %v301_v14  ;;  %v299_v17 = vmul.f32 %v742_v47, %v262_v15  ;;  %v891_v49 = vpop.f32.mrf.mxu1  ;;  %v1114_v12 = vand.u32 127, %v579_v10  ;;  %v1117_v15 = vshrl.u32 %v579_v10, 7 }
 0x107   :  { %v840_v16 = vpop.f32.mrf.mxu0 }
 0x108   :  { %322 = vadd.xlane.f32.xlu0 %v298_v13  ;;  %v304_v21 = vmul.f32 %v840_v16, %v753_v54  ;;  %v470_v54 = vpop.f32.mrf.mxu1  ;;  %v585_v13 = vadd.s32 4294967288, %v1114_v12 }
 0x109   :  { %v275_v18 = vpop.f32.mrf.mxu0 }
 0x10a   :  { %v302_v19 = vmul.f32 %v749_v51, %v275_v18  ;;  %324 = vadd.xlane.f32.xlu1 %v299_v17  ;;  %v894_v59 = vpop.f32.mrf.mxu1  ;;  %v588_v16 = vsub.s32 %v585_v13, %v1117_v15  ;;  %v592_v18 = vadd.s32 4294967280, %v1114_v12 }
 0x10b   :  { %v841_v20 = vpop.f32.mrf.mxu0 }
 0x10c   :  { %v305_v22 = vmul.f32 %v841_v20, %v754_v55  ;;  %330 = vadd.xlane.f32.xlu0 %v302_v19  ;;  %v480_v62 = vpop.f32.mrf.mxu1  ;;  %v583_v19 = vsub.s32 %v1114_v12, %v1117_v15 }
 0x10d   :  { %v278_v23 = vpop.f32.mrf.mxu0 }
 0x10e   :  { %336 = vadd.xlane.f32.xlu1 %v305_v22  ;;  %v303_v24 = vmul.f32 %v750_v53, %v278_v23  ;;  %v897_v3 = vpop.f32.mrf.mxu1  ;;  %v599_v22 = vadd.s32 4294967272, %v1114_v12 }
 0x110   :  { %334 = vadd.xlane.f32.xlu0 %v304_v21  ;;  %v490_v6 = vpop.f32.mrf.mxu1  ;;  %v606_v21 = vadd.s32 4294967264, %v1114_v12 }
 0x112   :  { %332 = vadd.xlane.f32.xlu1 %v303_v24 }
 0x17b   :  { %v311_v30 = vpop.xlane.xlu1 %310 }
 0x17c   :  { %v501_v32 = vadd.f32 %v430_v28, %v311_v30  ;;  %v609_v28 = vsub.s32 %v606_v21, %v1117_v15 }
 0x17d   :  { %v307_v33 = vpop.xlane.xlu0 %306 }
 0x17e   :  { %v499_v34 = vadd.f32 %v420_v26, %v307_v33  ;;  %538 = vperm.xlu1 %903, %v501_v32   ;;  %v613_v26 = vadd.s32 4294967256, %v1114_v12  ;;  %v620_v33 = vadd.s32 4294967248, %v1114_v12 }
 0x17f   :  { %v313_v35 = vpop.xlane.xlu1 %312 }
 0x180   :  { %v502_v37 = vadd.f32 %v879_v27, %v313_v35  ;;  %532 = vperm.xlu0 %904, %v499_v34   ;;  %v616_v34 = vsub.s32 %v613_v26, %v1117_v15 }
 0x181   :  { %v309_v38 = vpop.xlane.xlu0 %308 }
 0x182   :  { %541 = vperm.xlu1 %903, %v502_v37   ;;  %v500_v40 = vadd.f32 %v876_v25, %v309_v38  ;;  %v595_v25 = vsub.s32 %v592_v18, %v1117_v15 }
 0x185   :  { %v319_v41 = vpop.xlane.xlu0 %318 }
 0x186   :  { %535 = vperm.xlu1 %903, %v500_v40   ;;  %v505_v44 = vadd.f32 %v450_v39, %v319_v41  ;;  %v627_v39 = vadd.s32 4294967240, %v1114_v12  ;;  %v623_v41 = vsub.s32 %v620_v33, %v1117_v15 }
 0x187   :  { %v321_v43 = vpop.xlane.xlu1 %320 }
 0x188   :  { %v506_v52 = vadd.f32 %v885_v36, %v321_v43  ;;  %v634_v43 = vadd.s32 4294967232, %v1114_v12 }
 0x189   :  { %v315_v45 = vpop.xlane.xlu0 %314 }
 0x18a   :  { %550 = vperm.xlu1 %903, %v505_v44   ;;  %v503_v48 = vadd.f32 %v440_v31, %v315_v45  ;;  %v641_v45 = vadd.s32 4294967224, %v1114_v12 }
 0x18b   :  { %v317_v47 = vpop.xlane.xlu1 %316 }
 0x18c   :  { %v504_v56 = vadd.f32 %v882_v29, %v317_v47  ;;  %v602_v29 = vsub.s32 %v599_v22, %v1117_v15  ;;  %v648_v47 = vadd.s32 4294967216, %v1114_v12 }
 0x18d   :  { %v327_v50 = vpop.xlane.xlu0 %326 }
 0x18e   :  { %544 = vperm.xlu1 %903, %v503_v48   ;;  %v509_v61 = vadd.f32 %v470_v54, %v327_v50  ;;  %v630_v48 = vsub.s32 %v627_v39, %v1117_v15  ;;  %v637_v54 = vsub.s32 %v634_v43, %v1117_v15 }
 0x18f   :  { %v329_v51 = vpop.xlane.xlu1 %328 }
 0x190   :  { %v510_v53 = vadd.f32 %v891_v49, %v329_v51  ;;  %v655_v49 = vadd.s32 4294967208, %v1114_v12 }
 0x191   :  { %v323_v58 = vpop.xlane.xlu0 %322 }
 0x192   :  { %565 = vperm.xlu0 %904, %v510_v53   ;;  %553 = vperm.xlu1 %903, %v506_v52   ;;  %v507_v1 = vadd.f32 %v460_v46, %v323_v58  ;;  %v651_v58 = vsub.s32 %v648_v47, %v1117_v15 }
 0x193   :  { %v325_v55 = vpop.xlane.xlu1 %324 }
 0x194   :  { %v508_v57 = vadd.f32 %v888_v42, %v325_v55  ;;  %v662_v55 = vadd.s32 4294967200, %v1114_v12 }
 0x195   :  { %v331_v63 = vpop.xlane.xlu0 %330 }
 0x196   :  { %559 = vperm.xlu0 %904, %v508_v57   ;;  %547 = vperm.xlu1 %903, %v504_v56   ;;  %v511_v4 = vadd.f32 %v480_v62, %v331_v63  ;;  %v644_v56 = vsub.s32 %v641_v45, %v1117_v15  ;;  %v669_v62 = vadd.s32 4294967192, %v1114_v12 }
 0x197   :  { %v337_v60 = vpop.xlane.xlu1 %336 }
 0x198   :  { %v514_v5 = vadd.f32 %v897_v3, %v337_v60  ;;  %v658_v60 = vsub.s32 %v655_v49, %v1117_v15  ;;  %v672_v10 = vsub.s32 %v669_v62, %v1117_v15 }
 0x199   :  { %v335_v7 = vpop.xlane.xlu0 %334 }
 0x19a   :  { %562 = vperm.xlu1 %903, %v509_v61   ;;  %v513_v8 = vadd.f32 %v490_v6, %v335_v7 }
 0x19b   :  { %v333_v0 = vpop.xlane.xlu1 %332 }
 0x19c   :  { %v512_v2 = vadd.f32 %v894_v59, %v333_v0 }
 0x19e   :  { %571 = vperm.xlu0 %904, %v512_v2   ;;  %556 = vperm.xlu1 %903, %v507_v1   ;;  %v665_v1 = vsub.s32 %v662_v55, %v1117_v15  ;;  %v676_v2 = vadd.s32 4294967184, %v1114_v12 }
 0x1a2   :  { %577 = vperm.xlu0 %904, %v514_v5   ;;  %568 = vperm.xlu1 %903, %v511_v4   ;;  %v683_v5 = vadd.s32 4294967176, %v1114_v12 }
 0x1a4   :  { %v686_v18 = vsub.s32 %v683_v5, %v1117_v15 }
 0x1a6   :  { %574 = vperm.xlu1 %903, %v513_v8  }
 0x1f9   :  { %v539_v9 = vpop.permute.xlu1 %538 }
 0x1fa   :  { %v596_v32 = vrot.slane %v539_v9, %v595_v25 }
 0x1fb   :  { %v533_v20 = vpop.permute.xlu0 %532 }
 0x1fc   :  { %v584_v27 = vrot.slane %v533_v20, %v583_v19 }
 0x1fd   :  { %v542_v11 = vpop.permute.xlu1 %541 }
 0x1fe   :  { %v603_v38 = vrot.slane %v542_v11, %v602_v29 }
 0x201   :  { %v536_v14 = vpop.permute.xlu1 %535 }
 0x202   :  { %v589_v23 = vrot.slane %v536_v14, %v588_v16  ;;  %v679_v16 = vsub.s32 %v676_v2, %v1117_v15 }
 0x204   :  { %v591_v30 = vsel %vm590_vm0, %v589_v23, %v584_v27 }
 0x205   :  { %v551_v17 = vpop.permute.xlu1 %550  ;;  %v598_v35 = vsel %vm597_vm1, %v596_v32, %v591_v30 }
 0x206   :  { %v605_v44 = vsel %vm604_vm2, %v603_v38, %v598_v35  ;;  %v624_v52 = vrot.slane %v551_v17, %v623_v41 }
 0x209   :  { %v545_v24 = vpop.permute.xlu1 %544 }
 0x20a   :  { %v610_v36 = vrot.slane %v545_v24, %v609_v28 }
 0x20c   :  { %v612_v46 = vsel %vm611_vm3, %v610_v36, %v605_v44 }
 0x20d   :  { %v554_v31 = vpop.permute.xlu1 %553  ;;  %v566_v37 = vpop.permute.xlu0 %565 }
 0x20e   :  { %v631_v59 = vrot.slane %v554_v31, %v630_v48  ;;  %v659_v8 = vrot.slane %v566_v37, %v658_v60 }
 0x211   :  { %v548_v40 = vpop.permute.xlu1 %547  ;;  %v560_v53 = vpop.permute.xlu0 %559 }
 0x212   :  { %v617_v42 = vrot.slane %v548_v40, %v616_v34  ;;  %v645_v3 = vrot.slane %v560_v53, %v644_v56 }
 0x214   :  { %v619_v50 = vsel %vm618_vm4, %v617_v42, %v612_v46 }
 0x215   :  { %v563_v51 = vpop.permute.xlu1 %562  ;;  %v626_v57 = vsel %vm625_vm5, %v624_v52, %v619_v50 }
 0x216   :  { %v633_v4 = vsel %vm632_vm6, %v631_v59, %v626_v57  ;;  %v652_v6 = vrot.slane %v563_v51, %v651_v58 }
 0x219   :  { %v557_v61 = vpop.permute.xlu1 %556  ;;  %v572_v0 = vpop.permute.xlu0 %571 }
 0x21a   :  { %v638_v63 = vrot.slane %v557_v61, %v637_v54  ;;  %v673_v12 = vrot.slane %v572_v0, %v672_v10 }
 0x21c   :  { %v640_v7 = vsel %vm639_vm7, %v638_v63, %v633_v4 }
 0x21d   :  { %v647_v9 = vsel %vm646_vm8, %v645_v3, %v640_v7  ;;  %v569_v11 = vpop.permute.xlu1 %568  ;;  %v578_v20 = vpop.permute.xlu0 %577 }
 0x21e   :  { %v654_v13 = vsel %vm653_vm9, %v652_v6, %v647_v9  ;;  %v666_v14 = vrot.slane %v569_v11, %v665_v1  ;;  %v687_v23 = vrot.slane %v578_v20, %v686_v18 }
 0x21f   :  { %v661_v17 = vsel %vm660_vm10, %v659_v8, %v654_v13 }
 0x220   :  { %v668_v19 = vsel %vm667_vm11, %v666_v14, %v661_v17 }
 0x221   :  { %v575_v21 = vpop.permute.xlu1 %574  ;;  %v675_v24 = vsel %vm674_vm12, %v673_v12, %v668_v19 }
 0x222   :  { %v680_v22 = vrot.slane %v575_v21, %v679_v16 }
 0x224   :  { %v682_v25 = vsel %vm681_vm13, %v680_v22, %v675_v24 }
 0x225   :  { %v689_v26 = vsel %vm688_vm14, %v687_v23, %v682_v25 }
 0x226   :  { %691 = vst [vmem:[#allocation5] sm:$0x1] %v689_v26 }
 0x227   :  { %952 = shalt.err (!%p949_p9)
}
 0x228   :  { %701 = dma.vmem_to_hbm [thread:$0]  %s699_s29, 16, %s1157_s4, [#allocation4]  }
 0x229   :  { %963 = dma.done.wait [#allocation4], 16  }
 0x22a   :  { %964 = vsyncadd [#allocation4], 4294967280 }
 0x22b   :  { %705 = vsyncpa [#allocation3], 1 }
 0x22c   :  { %706 = vsyncpa [#allocation4], 1 }

</bundles_post_ra>
